<compile_context>
chip_gen: v6e
topology: v6e:2x2x1
jax: 0.10.0
libtpu: 0.0.40
codegen_flags: <defaults>
</compile_context>

<pallas_src>
import jax
import jax.numpy as jnp
from jax import lax
from jax.experimental import pallas as pl
from jax.experimental.pallas import tpu as pltpu


def _disc_kernel(x_ref, w1_ref, b1_ref, w2_ref, b2_ref, w3_ref, b3_ref, o_ref):
    cdt = w1_ref.dtype  # compute dtype for MXU operands (f32 or bf16)

    # fc1 (transposed): (h1, z) . (tb, z)^T -> (h1, tb); batch lands on lanes.
    h = lax.dot_general(
        w1_ref[...], x_ref[...],
        dimension_numbers=(((1,), (1,)), ((), ())),
        preferred_element_type=jnp.float32,
    )
    h = jnp.maximum(h + b1_ref[...], 0.0)            # (h1,1) lane-broadcast, f32

    # fc2: (h2, h1) @ (h1, tb) -> (h2, tb)
    h = jnp.dot(w2_ref[...], h.astype(cdt), preferred_element_type=jnp.float32)
    h = jnp.maximum(h + b2_ref[...], 0.0)            # (h2,1) lane-broadcast, f32

    # fc3: (1, h2) @ (h2, tb) -> (1, tb); lane-dense output row.
    logits = jnp.dot(w3_ref[...], h.astype(cdt), preferred_element_type=jnp.float32)
    logits = logits + b3_ref[0, 0]                   # scalar bias straight from SMEM
    o_ref[...] = jax.nn.sigmoid(logits).astype(o_ref.dtype)


def discriminator_forward(x, params, *, batch_tile=4096, compute_dtype=None,
                          core_parallel=False):
    """x: (B, z_dim) float32.  Returns sigmoid(fc3(relu(fc2(relu(fc1(x)))))) as (B, 1).

    batch_tile: lane-tile over the batch axis for B > batch_tile; must be a
      multiple of 128 (prefer a multiple of 256 on v6e/v7x).
    compute_dtype: optional MXU input dtype (e.g. jnp.bfloat16 on v6e/v7x);
      accumulation and the bias/ReLU/sigmoid epilogue stay f32.
    core_parallel: set True on v7x so the batch grid splits across both
      TensorCores (pltpu.CORE_PARALLEL).
    """
    assert batch_tile % 128 == 0, "batch_tile must be a multiple of 128"

    w1, b1 = params["w1"], params["b1"]      # (h1, z),  (h1, 1)   -- PyTorch (out,in)
    w2, b2 = params["w2"], params["b2"]      # (h2, h1), (h2, 1)
    w3, b3 = params["w3"], params["b3"]      # (1, h2),  (1, 1)

    if compute_dtype is not None and compute_dtype != jnp.float32:
        x = x.astype(compute_dtype)
        w1 = w1.astype(compute_dtype)
        w2 = w2.astype(compute_dtype)
        w3 = w3.astype(compute_dtype)

    B, zin = x.shape
    assert zin == w1.shape[1], "feature dim mismatch"

    vmem = pl.BlockSpec(memory_space=pltpu.MemorySpace.VMEM)
    smem = pl.BlockSpec(memory_space=pltpu.MemorySpace.SMEM)
    weight_specs = [vmem, vmem, vmem, vmem, vmem, smem]   # w1 b1 w2 b2 w3 | b3

    if B <= batch_tile:
        # Tiny/medium batch: everything is VMEM-resident; no grid, no pipelining.
        out = pl.pallas_call(
            _disc_kernel,
            out_shape=jax.ShapeDtypeStruct((1, B), jnp.float32),
            in_specs=[vmem] + weight_specs,
            out_specs=vmem,
        )(x, w1, b1, w2, b2, w3, b3)
        return out.reshape(B, 1)

    # Large batch: tile over B only (ragged tail handled by Pallas -- OOB reads
    # of the last x block are garbage rows whose OOB output writes are dropped;
    # rows are independent so in-bounds results are unaffected).  Weights stay
    # resident across all steps.
    tb = batch_tile
    n_steps = pl.cdiv(B, tb)
    sem = pltpu.CORE_PARALLEL if core_parallel else pltpu.PARALLEL
    out = pl.pallas_call(
        _disc_kernel,
        out_shape=jax.ShapeDtypeStruct((1, B), jnp.float32),
        grid=(n_steps,),
        in_specs=[pl.BlockSpec((tb, zin), lambda i: (i, 0))] + weight_specs,
        out_specs=pl.BlockSpec((1, tb), lambda i: (0, i)),
        compiler_params=pltpu.CompilerParams(dimension_semantics=(sem,)),
    )(x, w1, b1, w2, b2, w3, b3)
    return out.reshape(B, 1)


def init_params(key, z_dim, h1_dim, h2_dim):
    """Mimic nn.Linear default init U(-1/sqrt(fan_in), 1/sqrt(fan_in)).

    All weights use PyTorch (out, in) layout so the kernel keeps the batch on
    the lane axis for the whole network; biases are stored as (out, 1) columns.
    """
    ks = jax.random.split(key, 6)

    def uniform(k, shape, fan_in):
        bound = 1.0 / (fan_in ** 0.5)
        return jax.random.uniform(k, shape, jnp.float32, -bound, bound)

    w1 = uniform(ks[0], (h1_dim, z_dim), z_dim)
    b1 = uniform(ks[1], (h1_dim, 1), z_dim)
    w2 = uniform(ks[2], (h2_dim, h1_dim), h1_dim)
    b2 = uniform(ks[3], (h2_dim, 1), h1_dim)
    w3 = uniform(ks[4], (1, h2_dim), h2_dim)
    b3 = uniform(ks[5], (1, 1), h2_dim)
    return {"w1": w1, "b1": b1, "w2": w2, "b2": b2, "w3": w3, "b3": b3}


def reference(x, params):
    """Plain-JAX reference with identical math / params ((out,in) weights)."""
    h = jnp.maximum(x @ params["w1"].T + params["b1"].T, 0.0)
    h = jnp.maximum(h @ params["w2"].T + params["b2"].T, 0.0)
    return jax.nn.sigmoid(h @ params["w3"].T + params["b3"])


if __name__ == "__main__":
    z_dim, h1_dim, h2_dim = 10, 32, 32

    key = jax.random.PRNGKey(0)
    k_x1, k_x2, k_p = jax.random.split(key, 3)
    params = init_params(k_p, z_dim, h1_dim, h2_dim)

    # Small batch: grid-less, fully VMEM-resident path.
    x_small = jax.random.normal(k_x1, (8, z_dim), jnp.float32)
    out_small = jax.block_until_ready(discriminator_forward(x_small, params))
    assert out_small.shape == (8, 1)
    assert jnp.allclose(out_small, reference(x_small, params), atol=1e-5, rtol=1e-5)

    # Larger batch: batch-tiled path with a ragged tail (B=300, tb=256 ->
    # 2 grid steps, last block's 212..299 in-bounds, 44 OOB lanes discarded).
    x_big = jax.random.normal(k_x2, (300, z_dim), jnp.float32)
    out_big = jax.block_until_ready(
        discriminator_forward(x_big, params, batch_tile=256))
    assert out_big.shape == (300, 1)
    assert jnp.allclose(out_big, reference(x_big, params), atol=1e-5, rtol=1e-5)

    # bf16 compute path (v6e/v7x recommendation): bf16 MXU inputs, f32
    # accumulation + f32 epilogue; compare against the f32 reference loosely.
    out_bf16 = jax.block_until_ready(
        discriminator_forward(x_big, params, batch_tile=256,
                              compute_dtype=jnp.bfloat16))
    assert out_bf16.shape == (300, 1)
    assert jnp.allclose(out_bf16, reference(x_big, params), atol=5e-2)

    # TODO(synk): on v7x pass core_parallel=True (with an even grid step count)
    # so the batch axis shards across both TensorCores.
    print("KERNEL_OK")
</pallas_src>

<mosaic_0001>
module attributes {stable_mosaic.version = 11 : i64} {
  func.func @_disc_kernel(%arg0: memref<8x10xf32, #tpu.memory_space<vmem>>, %arg1: memref<32x10xf32, #tpu.memory_space<vmem>>, %arg2: memref<32x1xf32, #tpu.memory_space<vmem>>, %arg3: memref<32x32xf32, #tpu.memory_space<vmem>>, %arg4: memref<32x1xf32, #tpu.memory_space<vmem>>, %arg5: memref<1x32xf32, #tpu.memory_space<vmem>>, %arg6: memref<1x1xf32, #tpu.memory_space<smem>>, %arg7: memref<1x8xf32, #tpu.memory_space<vmem>>) attributes {dimension_semantics = [], scalar_prefetch = 0 : i64, scratch_operands = 0 : i64, tpu.core_type = #tpu.core_type<tc>} {
    %c0 = arith.constant 0 : index
    %c0_0 = arith.constant 0 : index
    %0 = vector.load %arg1[%c0, %c0_0] : memref<32x10xf32, #tpu.memory_space<vmem>>, vector<32x10xf32>
    %c0_1 = arith.constant 0 : index
    %c0_2 = arith.constant 0 : index
    %1 = vector.load %arg0[%c0_1, %c0_2] : memref<8x10xf32, #tpu.memory_space<vmem>>, vector<8x10xf32>
    %cst = arith.constant dense<0.000000e+00> : vector<32x8xf32>
    %2 = tpu.matmul %0, %1, %cst {dimension_numbers = #tpu.dot_dimension_numbers<[1], [1], [0], [0], [0, 0, 1, 0], [], []>} : vector<32x10xf32>, vector<8x10xf32>, vector<32x8xf32> -> vector<32x8xf32>
    %c0_3 = arith.constant 0 : index
    %c0_4 = arith.constant 0 : index
    %3 = vector.load %arg2[%c0_3, %c0_4] : memref<32x1xf32, #tpu.memory_space<vmem>>, vector<32x1xf32>
    %4 = vector.broadcast %3 : vector<32x1xf32> to vector<32x8xf32>
    %5 = arith.addf %2, %4 : vector<32x8xf32>
    %cst_5 = arith.constant 0.000000e+00 : f32
    %6 = vector.broadcast %cst_5 : f32 to vector<32x8xf32>
    %7 = arith.maximumf %5, %6 : vector<32x8xf32>
    %c0_6 = arith.constant 0 : index
    %c0_7 = arith.constant 0 : index
    %8 = vector.load %arg3[%c0_6, %c0_7] : memref<32x32xf32, #tpu.memory_space<vmem>>, vector<32x32xf32>
    %cst_8 = arith.constant dense<0.000000e+00> : vector<32x8xf32>
    %9 = tpu.matmul %8, %7, %cst_8 {dimension_numbers = #tpu.dot_dimension_numbers<[1], [0], [0], [1], [0, 0, 1, 1], [], []>} : vector<32x32xf32>, vector<32x8xf32>, vector<32x8xf32> -> vector<32x8xf32>
    %c0_9 = arith.constant 0 : index
    %c0_10 = arith.constant 0 : index
    %10 = vector.load %arg4[%c0_9, %c0_10] : memref<32x1xf32, #tpu.memory_space<vmem>>, vector<32x1xf32>
    %11 = vector.broadcast %10 : vector<32x1xf32> to vector<32x8xf32>
    %12 = arith.addf %9, %11 : vector<32x8xf32>
    %cst_11 = arith.constant 0.000000e+00 : f32
    %13 = vector.broadcast %cst_11 : f32 to vector<32x8xf32>
    %14 = arith.maximumf %12, %13 : vector<32x8xf32>
    %c0_12 = arith.constant 0 : index
    %c0_13 = arith.constant 0 : index
    %15 = vector.load %arg5[%c0_12, %c0_13] : memref<1x32xf32, #tpu.memory_space<vmem>>, vector<1x32xf32>
    %cst_14 = arith.constant dense<0.000000e+00> : vector<1x8xf32>
    %16 = tpu.matmul %15, %14, %cst_14 {dimension_numbers = #tpu.dot_dimension_numbers<[1], [0], [0], [1], [0, 0, 1, 1], [], []>} : vector<1x32xf32>, vector<32x8xf32>, vector<1x8xf32> -> vector<1x8xf32>
    %c0_15 = arith.constant 0 : index
    %c0_16 = arith.constant 0 : index
    %17 = memref.load %arg6[%c0_15, %c0_16] : memref<1x1xf32, #tpu.memory_space<smem>>
    %18 = vector.broadcast %17 : f32 to vector<1x8xf32>
    %19 = arith.addf %16, %18 : vector<1x8xf32>
    %20 = arith.negf %19 : vector<1x8xf32>
    %21 = math.exp %20 : vector<1x8xf32>
    %cst_17 = arith.constant 1.000000e+00 : f32
    %22 = vector.broadcast %cst_17 : f32 to vector<1x8xf32>
    %23 = arith.addf %22, %21 : vector<1x8xf32>
    %24 = arith.divf %22, %23 : vector<1x8xf32>
    %c0_18 = arith.constant 0 : index
    %c0_19 = arith.constant 0 : index
    %25 = vector.load %arg7[%c0_18, %c0_19] : memref<1x8xf32, #tpu.memory_space<vmem>>, vector<1x8xf32>
    tpu.vector_store %arg7[%c0_18, %c0_19], %24 {strides = array<i32>} : memref<1x8xf32, #tpu.memory_space<vmem>>, vector<1x8xf32>,
    return
  }
}

</mosaic_0001>

<bundles_post_ra>
// kernel: tpu_custom_call.1
= control target key start
LH: loop header
LB: loop body
LE: loop exit
PB: predicated region body
PF: predicated region fallthrough
CT: control target
= control target key end

     0   :  { %vm57_vm0 = vcmask 80896   ;;  %v484_v4 = vmov 0   ;;  %s599_s0 = inlined_call_operand.vmem [shape: f32[8,10], index: 0, kind: input, shape index: {}]   ;;  %s600_s1 = inlined_call_operand.vmem [shape: f32[32,10], index: 1, kind: input, shape index: {}]   ;;  %s601_s2 = inlined_call_operand.vmem [shape: f32[32,1], index: 2, kind: input, shape index: {}]   ;;  %s602_s3 = inlined_call_operand.vmem [shape: f32[32,32], index: 3, kind: input, shape index: {}]   ;;  %s603_s4 = inlined_call_operand.vmem [shape: f32[32,1], index: 4, kind: input, shape index: {}]   ;;  %s604_s5 = inlined_call_operand.vmem [shape: f32[1,32], index: 5, kind: input, shape index: {}]   ;;  %s605_s6 = inlined_call_operand.<no memory space> [shape: f32[1,1], index: 6, kind: input, shape index: {}]   ;;  %s606_s7 = inlined_call_operand.hbm [shape: f32[1,8], index: 7, kind: output, shape index: {}]  }
   0x1   :  { %v32_v0 = vld [vmem:[%s599_s0] sm:$0xff]  ;;  %v36_v2 = vld [vmem:[%s601_s2 + $0x18] sm:$0xff]  ;;  %v29_v3 = vld [vmem:[%s600_s1 + $0x8] sm:$0xff]  ;;  %456 = vset.pattern.permute.xlu0 %v484_v4  ;;  %457 = vset.pattern.permute.xlu1 %v484_v4 }
   0x2   :  { %v28_v1 = vld [vmem:[%s600_s1] sm:$0xff]  ;;  %419 = vmatprep.subr.msk.mxu0 %vm57_vm0, %v32_v0  ;;  %v34_v5 = vld [vmem:[%s601_s2 + $0x8] sm:$0xff]  ;;  %v30_v6 = vld [vmem:[%s600_s1 + $0x10] sm:$0xff]  ;;  %54 = vperm.xlu0 %456, %v36_v2  }
   0x3   :  { %421 = vmatprep.mubr.msk.f32.mxu0 %vm57_vm0, %v28_v1  ;;  %420 = vmatpush3.xpose.msk.msra.mxu0 %vm57_vm0, %v32_v0  ;;  %v35_v7 = vld [vmem:[%s601_s2 + $0x10] sm:$0xff] }
   0x4   :  { %44 = vperm.xlu1 %457, %v34_v5  }
   0x5   :  { %13 = vsyncpa [#allocation4], 0  ;;  %v33_v8 = vld [vmem:[%s601_s2] sm:$0xff]  ;;  %v31_v9 = vld [vmem:[%s600_s1 + $0x18] sm:$0xff]  ;;  %vm190_vm1 = vcmask 261120   ;;  %v485_v34 = vmov 0.0   ;;  %v294_v52 = vstv %s605_s6 }
   0x6   :  { %422 = vmatmul.mubr.msk.f32.vlgmr.msra.gmra.mxu0 %vm57_vm0, %v29_v3  ;;  %49 = vperm.xlu0 %456, %v35_v7   ;;  %v169_v10 = vld [vmem:[%s603_s4 + $0x18] sm:$0xff]  ;;  %v168_v11 = vld [vmem:[%s603_s4 + $0x10] sm:$0xff]  ;;  %v167_v12 = vld [vmem:[%s603_s4 + $0x8] sm:$0xff]  ;;  %vm486_vm2 = vmmov 0   ;;  %s487_s10 = smov [#allocation3]   ;;  %vm374_vm3 = vcmask 57344  }
   0x7   :  { %424 = vmatprep.mubr.msk.f32.mxu0 %vm57_vm0, %v30_v6  ;;  %v166_v13 = vld [vmem:[%s603_s4] sm:$0xff]  ;;  %v163_v31 = vld [vmem:[%s602_s3 + $0x8] sm:$0xff]  ;;  %v164_v32 = vld [vmem:[%s602_s3 + $0x10] sm:$0xff]  ;;  %441 = vmatprep.subr.mxu0 %v485_v34  ;;  %s382_s11 = sshll.u32 %s487_s10, 4  ;;  %s383_s11 = int_to_ptr.vmem [resolvable:$true] %s382_s11 }
   0x8   :  { %39 = vperm.xlu1 %457, %v33_v8   ;;  %v162_v14 = vld [vmem:[%s602_s3] sm:$0xff]  ;;  %v165_v33 = vld [vmem:[%s602_s3 + $0x18] sm:$0xff]  ;;  %s466_s12 = scalar_lea.vmem %s383_s11, 32  ;;  %p467_p1 = scmp.lt.s32.totalorder %s383_s11, %s383_s11 }
   0x9   :  { %435 = vmatprep.mubr.msk.f32.mxu1 %vm190_vm1, %v162_v14  ;;  %v292_v51 = vld [vmem:[%s604_s5] sm:$0x1]  ;;  %s462_s5 = scalar_lea.vmem %s383_s11, 16 }
   0xa   :  { %425 = vmatmul.mubr.msk.f32.gmra.mxu0 %vm57_vm0, %v31_v9  ;;  %187 = vperm.xlu0 %456, %v169_v10   ;;  %p463_p0 = scmp.ne.s32.totalorder %s383_s11, %s462_s5  ;;  %p468_p2 = scmp.lt.s32.totalorder %s466_s12, %s462_s5 }
   0xb   :  { %449 = vmatprep.mubr.msk.f32.mxu0 %vm486_vm2, %v485_v34 }
   0xc   :  { %182 = vperm.xlu1 %457, %v168_v11   ;;  %p469_p3 = por %p468_p2, %p467_p1 }
   0xe   :  { %177 = vperm.xlu0 %456, %v167_v12   ;;  %p470_p4 = pnand %p469_p3, %p463_p0 }
  0x10   :  { %172 = vperm.xlu1 %457, %v166_v13  }
  0x7d   :  { %v55_v15 = vpop.permute.xlu0 %54 }
  0x7f   :  { %v45_v17 = vpop.permute.xlu1 %44 }
  0x81   :  { %v50_v21 = vpop.permute.xlu0 %49 }
  0x83   :  { %v40_v26 = vpop.permute.xlu1 %39 }
  0x85   :  { %v188_v35 = vpop.permute.xlu0 %187 }
  0x87   :  { %v183_v37 = vpop.permute.xlu1 %182 }
  0x89   :  { %v178_v41 = vpop.permute.xlu0 %177 }
  0x8b   :  { %v173_v46 = vpop.permute.xlu1 %172 }
  0xc6   :  { %v423_v16 = vpop.f32.mrf.mxu0 }
  0xc7   :  { %v145_v23 = vadd.f32 %v423_v16, %v45_v17 }
  0xc8   :  { %v139_v18 = vpop.f32.mrf.mxu0 }
  0xc9   :  { %v140_v27 = vadd.f32 %v139_v18, %v40_v26  ;;  %v159_v29 = vmax.f32 %v145_v23, 0.0 }
  0xca   :  { %v426_v19 = vpop.f32.mrf.mxu0 }
  0xcb   :  { %v155_v20 = vadd.f32 %v426_v19, %v55_v15  ;;  %v158_v30 = vmax.f32 %v140_v27, 0.0 }
  0xcc   :  { %v149_v22 = vpop.f32.mrf.mxu0 }
  0xcd   :  { %v161_v24 = vmax.f32 %v155_v20, 0.0  ;;  %v150_v25 = vadd.f32 %v149_v22, %v50_v21 }
  0xcf   :  { %v160_v28 = vmax.f32 %v150_v25, 0.0  ;;  %427 = vmatprep.subr.mxu1 %v161_v24 }
  0xd0   :  { %428 = vmatpush3.msra.mxu1 %v161_v24 }
  0xd1   :  { %429 = vmatprep.subr.mxu1 %v160_v28 }
  0xd2   :  { %430 = vmatpush3.msra.mxu1 %v160_v28 }
  0xd3   :  { %431 = vmatprep.subr.mxu1 %v159_v29 }
  0xd4   :  { %432 = vmatpush3.msra.mxu1 %v159_v29 }
  0xd5   :  { %433 = vmatprep.subr.mxu1 %v158_v30 }
  0xd6   :  { %434 = vmatpush3.msra.mxu1 %v158_v30 }
  0xd7   :  { %436 = vmatmul.mubr.msk.f32.vlgmr.msra.gmra.mxu1 %vm190_vm1, %v163_v31 }
  0xd8   :  { %438 = vmatprep.mubr.msk.f32.mxu1 %vm190_vm1, %v164_v32 }
  0xdb   :  { %439 = vmatmul.mubr.msk.f32.gmra.mxu1 %vm190_vm1, %v165_v33 }
 0x197   :  { %v437_v36 = vpop.f32.mrf.mxu1 }
 0x198   :  { %v275_v43 = vadd.f32 %v437_v36, %v178_v41 }
 0x199   :  { %v269_v38 = vpop.f32.mrf.mxu1 }
 0x19a   :  { %v270_v47 = vadd.f32 %v269_v38, %v173_v46  ;;  %v289_v49 = vmax.f32 %v275_v43, 0.0 }
 0x19b   :  { %v440_v39 = vpop.f32.mrf.mxu1 }
 0x19c   :  { %v285_v40 = vadd.f32 %v440_v39, %v188_v35  ;;  %v288_v50 = vmax.f32 %v270_v47, 0.0 }
 0x19d   :  { %v279_v42 = vpop.f32.mrf.mxu1 }
 0x19e   :  { %v291_v44 = vmax.f32 %v285_v40, 0.0  ;;  %v280_v45 = vadd.f32 %v279_v42, %v183_v37 }
 0x1a0   :  { %v290_v48 = vmax.f32 %v280_v45, 0.0  ;;  %442 = vmatpush3.msra.mxu0 %v291_v44 }
 0x1a1   :  { %443 = vmatprep.subr.mxu0 %v485_v34 }
 0x1a2   :  { %444 = vmatpush3.msra.mxu0 %v290_v48 }
 0x1a3   :  { %445 = vmatprep.subr.mxu0 %v485_v34 }
 0x1a4   :  { %446 = vmatpush3.msra.mxu0 %v289_v49 }
 0x1a5   :  { %447 = vmatprep.subr.mxu0 %v485_v34 }
 0x1a6   :  { %448 = vmatpush3.msra.mxu0 %v288_v50 }
 0x1a7   :  { %450 = vmatmul.mubr.msk.f32.vlgmr.msra.gmra.mxu0 %vm190_vm1, %v292_v51 }
 0x267   :  { %v364_v53 = vpop.f32.mrf.mxu0 }
 0x268   :  { %v365_v54 = vadd.f32 %v364_v53, %v294_v52 }
 0x269   :  { %v451_v55 = vpop.f32.mrf.mxu0 }
 0x26a   :  { %v400_v56 = vmul.f32 -1.442695, %v365_v54 }
 0x26c   :  { %458 = vpow2.f32 %v400_v56 }
 0x279   :  { %v459_v57 = vpop.eup %458 }
 0x27a   :  { %v371_v58 = vadd.f32 1.0, %v459_v57 }
 0x27c   :  { %460 = vrcp.f32 %v371_v58 }
 0x289   :  { %v461_v59 = vpop.eup %460 }
 0x28a   :  { %375 = vst.msk [vmem:[#allocation3] sm:$0x1] %vm374_vm3, %v461_v59 }
 0x28b   :  { %473 = shalt.err (!%p470_p4)
}
 0x28c   :  { %385 = dma.vmem_to_hbm [thread:$0]  %s383_s11, 16, %s606_s7, [#allocation4]  }
 0x28d   :  { %482 = dma.done.wait [#allocation4], 16  }
 0x28e   :  { %483 = vsyncadd [#allocation4], 4294967280 }
 0x28f   :  { %389 = vsyncpa [#allocation4], 1 }

</bundles_post_ra>
